<compile_context>
chip_gen: v7x
topology: tpu7x:2x2x1
jax: 0.10.0
libtpu: 0.0.40
codegen_flags: <defaults>
</compile_context>

<pallas_src>
import functools

import jax
import jax.numpy as jnp
from jax.experimental import pallas as pl
from jax.experimental.pallas import tpu as pltpu


LANE = 128
SUBLANE_BF16 = 16  # bf16 packs 16 sublanes per vreg
HIDDEN = 64


def _round_up(n, m):
    return ((n + m - 1) // m) * m


# ------------------------------------------------------------------ kernel ---
def actor_kernel(x_ref, w1_ref, b1_ref, w2_ref, b2_ref, w3_ref, b3_ref, out_ref):
    # x arrives as f32; cast to bf16 in-kernel (MXU operands), accumulate in f32.
    x = x_ref[...].astype(jnp.bfloat16)                               # (TB, D)

    # layer 1: Linear(D, 64) + ReLU
    a = jnp.dot(x, w1_ref[...], preferred_element_type=jnp.float32) + b1_ref[...]
    a = jnp.maximum(a, 0.0).astype(jnp.bfloat16)

    # layer 2: Linear(64, 64) + ReLU
    a = jnp.dot(a, w2_ref[...], preferred_element_type=jnp.float32) + b2_ref[...]
    a = jnp.maximum(a, 0.0).astype(jnp.bfloat16)

    # layer 3: single fused matmul producing [mu | std_logits] packed over lanes
    y = jnp.dot(a, w3_ref[...], preferred_element_type=jnp.float32) + b3_ref[...]

    half = y.shape[-1] // 2
    lane = jax.lax.broadcasted_iota(jnp.int32, y.shape, dimension=1)
    std = 7.0 * jax.nn.sigmoid(y) + 1e-8
    # lanes [0, half) -> mu (raw logits), lanes [half, 2*half) -> std
    out_ref[...] = jnp.where(lane >= half, std, y)                    # lane-dense f32 store


# ----------------------------------------------------------------- wrapper ---
@functools.partial(jax.jit, static_argnames=("act_dim", "block_batch"))
def actor_forward(x, params, *, act_dim, block_batch=4096):
    """x: (B, input_dim) f32.  Returns (mu, std), each (B, act_dim) f32."""
    w1, b1, w2, b2, w3, b3 = params
    batch, input_dim = x.shape
    hidden = w1.shape[1]
    width = w3.shape[1]                       # 2 * half (multiple of 128)
    half = width // 2

    # Batch tiling: multiples of 16 sublanes (bf16 packing); keep >= 2 grid
    # steps for large batches so the "parallel" axis can shard over v7x's 2 TCs.
    b_round = _round_up(batch, SUBLANE_BF16)
    tb = min(block_batch, b_round)
    if b_round >= 2 * SUBLANE_BF16:
        tb = min(tb, _round_up(pl.cdiv(b_round, 2), SUBLANE_BF16))
    b_pad = _round_up(batch, tb)
    if b_pad != batch:
        x = jnp.pad(x, ((0, b_pad - batch), (0, 0)))
    grid = (b_pad // tb,)

    def resident(shape):                      # weights/biases: DMA'd once, VMEM-resident
        return pl.BlockSpec(shape, lambda i: (0, 0))

    cost = pl.CostEstimate(
        flops=2 * b_pad * (input_dim * hidden + hidden * hidden + hidden * width),
        transcendentals=b_pad * width,        # sigmoid
        bytes_accessed=(b_pad * input_dim * 4 + b_pad * width * 4
                        + (input_dim * hidden + hidden * hidden + hidden * width) * 2
                        + (2 * hidden + width) * 4),
    )

    out = pl.pallas_call(
        actor_kernel,
        out_shape=jax.ShapeDtypeStruct((b_pad, width), jnp.float32),
        grid=grid,
        in_specs=[
            pl.BlockSpec((tb, input_dim), lambda i: (i, 0)),   # x tile (f32)
            resident((input_dim, hidden)),                     # W1 (bf16)
            resident((1, hidden)),                             # b1 (f32)
            resident((hidden, hidden)),                        # W2 (bf16)
            resident((1, hidden)),                             # b2 (f32)
            resident((hidden, width)),                         # W3 packed [mu|std] (bf16)
            resident((1, width)),                              # b3 packed (f32)
        ],
        out_specs=pl.BlockSpec((tb, width), lambda i: (i, 0)),
        compiler_params=pltpu.CompilerParams(
            dimension_semantics=("parallel",),                 # megacore on v7x
        ),
        cost_estimate=cost,
    )(x, w1, b1, w2, b2, w3, b3)

    out = out[:batch]
    mu = out[:, :act_dim]
    std = out[:, half:half + act_dim]
    return mu, std


# ----------------------------------------------------- parameter generation ---
def orthogonal(key, out_dim, in_dim):
    """Mimic torch.nn.init.orthogonal_ for a (out_dim, in_dim) weight matrix."""
    rows, cols = out_dim, in_dim
    flat = jax.random.normal(key, (max(rows, cols), min(rows, cols)),
                             dtype=jnp.float32)
    q, r = jnp.linalg.qr(flat)
    q = q * jnp.sign(jnp.diag(r))[None, :]      # sign-correct for uniqueness
    if rows < cols:
        q = q.T
    return q[:rows, :cols]


def make_params(key, input_dim, output_dim):
    """Kernel-layout params: weights pre-transposed to (in, out), bf16 operands.
    Layer-3 is a single packed (64, 2*half) matrix: mu half in lanes [0, half),
    std-logit half in lanes [half, 2*half), each half zero-padded; half >= 64 so
    the packed width is a lane-dense multiple of 128. Biases stay f32."""
    k1, k2, k3 = jax.random.split(key, 3)
    half = max(64, _round_up(output_dim, 64))
    width = 2 * half

    w1 = orthogonal(k1, HIDDEN, input_dim).T                    # (input_dim, 64)
    w2 = orthogonal(k2, HIDDEN, HIDDEN).T                       # (64, 64)
    w3 = orthogonal(k3, output_dim * 2, HIDDEN).T               # (64, 2*output_dim)

    w3_packed = jnp.zeros((HIDDEN, width), jnp.float32)
    w3_packed = w3_packed.at[:, :output_dim].set(w3[:, :output_dim])          # mu half
    w3_packed = w3_packed.at[:, half:half + output_dim].set(w3[:, output_dim:])  # std half

    b1 = jnp.zeros((1, HIDDEN), jnp.float32)
    b2 = jnp.zeros((1, HIDDEN), jnp.float32)
    b3 = jnp.zeros((1, width), jnp.float32)

    return (w1.astype(jnp.bfloat16), b1,
            w2.astype(jnp.bfloat16), b2,
            w3_packed.astype(jnp.bfloat16), b3)


def actor_forward_ref(x, params, act_dim):
    """Pure-JAX reference with the same bf16-operand / f32-accumulate recipe."""
    w1, b1, w2, b2, w3, b3 = params
    half = w3.shape[1] // 2
    a = x.astype(jnp.bfloat16)
    a = jnp.maximum(jnp.dot(a, w1, preferred_element_type=jnp.float32) + b1, 0.0)
    a = a.astype(jnp.bfloat16)
    a = jnp.maximum(jnp.dot(a, w2, preferred_element_type=jnp.float32) + b2, 0.0)
    a = a.astype(jnp.bfloat16)
    y = jnp.dot(a, w3, preferred_element_type=jnp.float32) + b3
    mu = y[:, :act_dim]
    std = 7.0 * jax.nn.sigmoid(y[:, half:half + act_dim]) + 1e-8
    return mu, std


# -------------------------------------------------------------------- main ---
if __name__ == "__main__":
    key = jax.random.PRNGKey(0)
    kx, kp = jax.random.split(key)

    batch, input_dim, output_dim = 64, 17, 6    # small continuous-control env
    block_batch = 16                            # small tile -> exercises the grid

    x = jax.random.normal(kx, (batch, input_dim), dtype=jnp.float32)
    params = make_params(kp, input_dim, output_dim)

    mu, std = actor_forward(x, params, act_dim=output_dim, block_batch=block_batch)
    mu = jax.block_until_ready(mu)
    std = jax.block_until_ready(std)

    mu_ref, std_ref = actor_forward_ref(x, params, output_dim)
    assert mu.shape == (batch, output_dim) and std.shape == (batch, output_dim)
    assert jnp.allclose(mu, mu_ref, atol=2e-3, rtol=2e-3), \
        f"mu mismatch: max abs err {jnp.max(jnp.abs(mu - mu_ref))}"
    assert jnp.allclose(std, std_ref, atol=2e-3, rtol=2e-3), \
        f"std mismatch: max abs err {jnp.max(jnp.abs(std - std_ref))}"
    assert bool(jnp.all(std > 0))

    # TODO(synk): dist/sample/logp (torch.distributions.Normal) are host-side
    # policy utilities, not part of the fused forward kernel.

    print("KERNEL_OK")
</pallas_src>

<mosaic_0001>
module attributes {stable_mosaic.version = 11 : i64} {
  func.func @actor_kernel(%arg0: i32, %arg1: memref<16x17xf32, #tpu.memory_space<vmem>>, %arg2: memref<17x64xbf16, #tpu.memory_space<vmem>>, %arg3: memref<1x64xf32, #tpu.memory_space<vmem>>, %arg4: memref<64x64xbf16, #tpu.memory_space<vmem>>, %arg5: memref<1x64xf32, #tpu.memory_space<vmem>>, %arg6: memref<64x128xbf16, #tpu.memory_space<vmem>>, %arg7: memref<1x128xf32, #tpu.memory_space<vmem>>, %arg8: memref<16x128xf32, #tpu.memory_space<vmem>>) attributes {dimension_semantics = [#tpu.dimension_semantics<parallel>], iteration_bounds = array<i64: 4>, scalar_prefetch = 0 : i64, scratch_operands = 0 : i64, tpu.core_type = #tpu.core_type<tc>, window_params = [{transform_indices = @transform_0, window_bounds = array<i64: 16, 17>}, {pipeline_mode = #tpu.pipeline_mode<synchronous>, transform_indices = @transform_1, window_bounds = array<i64: 17, 64>}, {pipeline_mode = #tpu.pipeline_mode<synchronous>, transform_indices = @transform_2, window_bounds = array<i64: 1, 64>}, {pipeline_mode = #tpu.pipeline_mode<synchronous>, transform_indices = @transform_3, window_bounds = array<i64: 64, 64>}, {pipeline_mode = #tpu.pipeline_mode<synchronous>, transform_indices = @transform_4, window_bounds = array<i64: 1, 64>}, {pipeline_mode = #tpu.pipeline_mode<synchronous>, transform_indices = @transform_5, window_bounds = array<i64: 64, 128>}, {pipeline_mode = #tpu.pipeline_mode<synchronous>, transform_indices = @transform_6, window_bounds = array<i64: 1, 128>}, {transform_indices = @transform_7, window_bounds = array<i64: 16, 128>}]} {
    %c0 = arith.constant 0 : index
    %c0_0 = arith.constant 0 : index
    %0 = vector.load %arg1[%c0, %c0_0] : memref<16x17xf32, #tpu.memory_space<vmem>>, vector<16x17xf32>
    %1 = arith.truncf %0 : vector<16x17xf32> to vector<16x17xbf16>
    %c0_1 = arith.constant 0 : index
    %c0_2 = arith.constant 0 : index
    %2 = vector.load %arg2[%c0_1, %c0_2] : memref<17x64xbf16, #tpu.memory_space<vmem>>, vector<17x64xbf16>
    %cst = arith.constant dense<0.000000e+00> : vector<16x64xf32>
    %3 = tpu.matmul %1, %2, %cst {dimension_numbers = #tpu.dot_dimension_numbers<[1], [0], [0], [1], [0, 0, 1, 1], [], []>} : vector<16x17xbf16>, vector<17x64xbf16>, vector<16x64xf32> -> vector<16x64xf32>
    %c0_3 = arith.constant 0 : index
    %c0_4 = arith.constant 0 : index
    %4 = vector.load %arg3[%c0_3, %c0_4] : memref<1x64xf32, #tpu.memory_space<vmem>>, vector<1x64xf32>
    %5 = vector.broadcast %4 : vector<1x64xf32> to vector<16x64xf32>
    %6 = arith.addf %3, %5 : vector<16x64xf32>
    %cst_5 = arith.constant 0.000000e+00 : f32
    %7 = vector.broadcast %cst_5 : f32 to vector<16x64xf32>
    %8 = arith.maximumf %6, %7 : vector<16x64xf32>
    %9 = arith.truncf %8 : vector<16x64xf32> to vector<16x64xbf16>
    %c0_6 = arith.constant 0 : index
    %c0_7 = arith.constant 0 : index
    %10 = vector.load %arg4[%c0_6, %c0_7] : memref<64x64xbf16, #tpu.memory_space<vmem>>, vector<64x64xbf16>
    %cst_8 = arith.constant dense<0.000000e+00> : vector<16x64xf32>
    %11 = tpu.matmul %9, %10, %cst_8 {dimension_numbers = #tpu.dot_dimension_numbers<[1], [0], [0], [1], [0, 0, 1, 1], [], []>} : vector<16x64xbf16>, vector<64x64xbf16>, vector<16x64xf32> -> vector<16x64xf32>
    %c0_9 = arith.constant 0 : index
    %c0_10 = arith.constant 0 : index
    %12 = vector.load %arg5[%c0_9, %c0_10] : memref<1x64xf32, #tpu.memory_space<vmem>>, vector<1x64xf32>
    %13 = vector.broadcast %12 : vector<1x64xf32> to vector<16x64xf32>
    %14 = arith.addf %11, %13 : vector<16x64xf32>
    %cst_11 = arith.constant 0.000000e+00 : f32
    %15 = vector.broadcast %cst_11 : f32 to vector<16x64xf32>
    %16 = arith.maximumf %14, %15 : vector<16x64xf32>
    %17 = arith.truncf %16 : vector<16x64xf32> to vector<16x64xbf16>
    %c0_12 = arith.constant 0 : index
    %c0_13 = arith.constant 0 : index
    %18 = vector.load %arg6[%c0_12, %c0_13] : memref<64x128xbf16, #tpu.memory_space<vmem>>, vector<64x128xbf16>
    %cst_14 = arith.constant dense<0.000000e+00> : vector<16x128xf32>
    %19 = tpu.matmul %17, %18, %cst_14 {dimension_numbers = #tpu.dot_dimension_numbers<[1], [0], [0], [1], [0, 0, 1, 1], [], []>} : vector<16x64xbf16>, vector<64x128xbf16>, vector<16x128xf32> -> vector<16x128xf32>
    %c0_15 = arith.constant 0 : index
    %c0_16 = arith.constant 0 : index
    %20 = vector.load %arg7[%c0_15, %c0_16] : memref<1x128xf32, #tpu.memory_space<vmem>>, vector<1x128xf32>
    %21 = vector.broadcast %20 : vector<1x128xf32> to vector<16x128xf32>
    %22 = arith.addf %19, %21 : vector<16x128xf32>
    %23 = tpu.iota {dimensions = array<i32: 1>} : vector<16x128xi32>
    %24 = arith.negf %22 : vector<16x128xf32>
    %25 = math.exp %24 : vector<16x128xf32>
    %cst_17 = arith.constant 1.000000e+00 : f32
    %26 = vector.broadcast %cst_17 : f32 to vector<16x128xf32>
    %27 = arith.addf %26, %25 : vector<16x128xf32>
    %28 = arith.divf %26, %27 : vector<16x128xf32>
    %cst_18 = arith.constant 7.000000e+00 : f32
    %29 = vector.broadcast %cst_18 : f32 to vector<16x128xf32>
    %30 = arith.mulf %29, %28 : vector<16x128xf32>
    %cst_19 = arith.constant 9.99999993E-9 : f32
    %31 = vector.broadcast %cst_19 : f32 to vector<16x128xf32>
    %32 = arith.addf %30, %31 : vector<16x128xf32>
    %c64_i32 = arith.constant 64 : i32
    %33 = vector.broadcast %c64_i32 : i32 to vector<16x128xi32>
    %34 = arith.cmpi sge, %23, %33 : vector<16x128xi32>
    %35 = arith.select %34, %32, %22 : vector<16x128xi1>, vector<16x128xf32>
    %c0_20 = arith.constant 0 : index
    %c0_21 = arith.constant 0 : index
    %36 = vector.load %arg8[%c0_20, %c0_21] : memref<16x128xf32, #tpu.memory_space<vmem>>, vector<16x128xf32>
    tpu.vector_store %arg8[%c0_20, %c0_21], %35 {strides = array<i32>} : memref<16x128xf32, #tpu.memory_space<vmem>>, vector<16x128xf32>,
    return
  }
  func.func @transform_0(%arg0: i32) -> (i32, i32) {
    %c0_i32 = arith.constant 0 : i32
    %c0_i32_0 = arith.constant 0 : i32
    return %arg0, %c0_i32 : i32, i32
  }
  func.func @transform_1(%arg0: i32) -> (i32, i32) {
    %c0_i32 = arith.constant 0 : i32
    %c0_i32_0 = arith.constant 0 : i32
    %c0_i32_1 = arith.constant 0 : i32
    return %c0_i32, %c0_i32_0 : i32, i32
  }
  func.func @transform_2(%arg0: i32) -> (i32, i32) {
    %c0_i32 = arith.constant 0 : i32
    %c0_i32_0 = arith.constant 0 : i32
    %c0_i32_1 = arith.constant 0 : i32
    return %c0_i32, %c0_i32_0 : i32, i32
  }
  func.func @transform_3(%arg0: i32) -> (i32, i32) {
    %c0_i32 = arith.constant 0 : i32
    %c0_i32_0 = arith.constant 0 : i32
    %c0_i32_1 = arith.constant 0 : i32
    return %c0_i32, %c0_i32_0 : i32, i32
  }
  func.func @transform_4(%arg0: i32) -> (i32, i32) {
    %c0_i32 = arith.constant 0 : i32
    %c0_i32_0 = arith.constant 0 : i32
    %c0_i32_1 = arith.constant 0 : i32
    return %c0_i32, %c0_i32_0 : i32, i32
  }
  func.func @transform_5(%arg0: i32) -> (i32, i32) {
    %c0_i32 = arith.constant 0 : i32
    %c0_i32_0 = arith.constant 0 : i32
    %c0_i32_1 = arith.constant 0 : i32
    return %c0_i32, %c0_i32_0 : i32, i32
  }
  func.func @transform_6(%arg0: i32) -> (i32, i32) {
    %c0_i32 = arith.constant 0 : i32
    %c0_i32_0 = arith.constant 0 : i32
    %c0_i32_1 = arith.constant 0 : i32
    return %c0_i32, %c0_i32_0 : i32, i32
  }
  func.func @transform_7(%arg0: i32) -> (i32, i32) {
    %c0_i32 = arith.constant 0 : i32
    %c0_i32_0 = arith.constant 0 : i32
    return %arg0, %c0_i32 : i32, i32
  }
}

</mosaic_0001>

<bundles_post_ra>
// kernel: actor_forward.1
= control target key start
LH: loop header
LB: loop body
LE: loop exit
PB: predicated region body
PF: predicated region fallthrough
CT: control target
= control target key end

     0   :  { %s762_s24 = smov 0   ;;  %s830_s0 = inlined_call_operand.vmem [shape: f32[64,17], index: 0, kind: input, shape index: {}]   ;;  %s831_s1 = inlined_call_operand.vmem [shape: bf16[17,64], index: 1, kind: input, shape index: {}]   ;;  %s832_s2 = inlined_call_operand.vmem [shape: f32[1,64], index: 2, kind: input, shape index: {}]   ;;  %s833_s3 = inlined_call_operand.vmem [shape: bf16[64,64], index: 3, kind: input, shape index: {}]   ;;  %s834_s4 = inlined_call_operand.vmem [shape: f32[1,64], index: 4, kind: input, shape index: {}]   ;;  %s835_s5 = inlined_call_operand.vmem [shape: bf16[64,128], index: 5, kind: input, shape index: {}]   ;;  %s836_s6 = inlined_call_operand.vmem [shape: f32[1,128], index: 6, kind: input, shape index: {}]   ;;  %s837_s7 = inlined_call_operand.vmem [shape: f32[64,128], index: 7, kind: output, shape index: {}]  }
   0x1 LB: > { %s608_s25 = sadd.s32 4294967295, %s717_s24   ;;  %p612_p0 = scmp.ge.s32.totalorder %s717_s24, 1  ;;  %s717_s24 = sphi %s762_s24, %s17_s24  }
   0x2   : > { %p238_p1 = scmp.lt.s32.totalorder %s717_s24, 5 }
   0x4   : > { %p239_p2 = pnand %p612_p0, %p238_p1 }
   0x5   : > { %v693_v0 = vld [vmem:[%s831_s1] sm:$0xff] (!%p239_p2)   ;;  %v719_v1 = vmov (!%p239_p2), 0.0   ;;  %v694_v2 = vld [vmem:[%s831_s1 + $0x8] ss:$0 sps:$4 sm:$0x11] (!%p239_p2)   ;;  %vm309_vm0 = vcmask (!%p239_p2), 1040384   ;;  %v529_v50 = vlaneseq (!%p239_p2) }
   0x6   : > { %242 = sbr.rel (%p239_p2) target bundleno = 707 (0x2c3), region = 48  ;;  %650 = vmatprep.subr.bf16.mxu0 (!%p239_p2), %v719_v1  ;;  %658 = vmatprep.subr.bf16.mxu1 (!%p239_p2), %v719_v1  ;;  %s613_s30 = sshll.u32 (!%p239_p2), %s608_s25, 1  ;;  %v720_v3 = vmov (!%p239_p2), 0   ;;  %vm721_vm1 = vmmov (!%p239_p2), 0   ;;  %v695_v5 = vld [vmem:[%s833_s3] sm:$0xff] (!%p239_p2)   ;;  %v696_v7 = vld [vmem:[%s833_s3 + $0x8] sm:$0xff] (!%p239_p2)  }
   0x7   : > { %651 = vmatpush3.bf16.msra.mxu0 (!%p239_p2), %v693_v0  ;;  %v311_v4 = vsel (!%p239_p2), %vm309_vm0, 65535, %v720_v3  ;;  %654 = vmatprep.mubr.msk.bf16.mxu0 (!%p239_p2), %vm721_vm1, %v719_v1  ;;  %p271_p3 = scmp.lt.s32.totalorder (!%p239_p2), %s613_s30, 7  ;;  %vm305_vm2 = vcmask (!%p239_p2), 138240   ;;  %v697_v11 = vld [vmem:[%s833_s3 + $0x10] sm:$0xff] (!%p239_p2)   ;;  %v698_v12 = vld [vmem:[%s833_s3 + $0x18] sm:$0xff] (!%p239_p2)   ;;  %v699_v13 = vld [vmem:[%s835_s5] sm:$0xff] (!%p239_p2)  }
   0x8   : > { %652 = vmatprep.subr.bf16.mxu0 (!%p239_p2), %v719_v1  ;;  %v313_v6 = vand.u32 (!%p239_p2), %v694_v2, %v311_v4  ;;  %666 = vmatprep.mubr.msk.bf16.mxu1 (!%p239_p2), %vm721_vm1, %v719_v1  ;;  %v700_v14 = vld [vmem:[%s835_s5 + $0x8] sm:$0xff] (!%p239_p2)   ;;  %v617_v15 = vld [vmem:[%s832_s2] ss:$0 sm:$0xff] (!%p239_p2)  ;;  %vm398_vm3 = vcmask (!%p239_p2), 523264   ;;  %v701_v25 = vld [vmem:[%s835_s5 + $0x10] sm:$0xff] (!%p239_p2)   ;;  %v530_v51 = vand.u32 (!%p239_p2), 127, %v529_v50 }
   0x9   : > { %659 = vmatpush3.bf16.msra.mxu1 (!%p239_p2), %v695_v5  ;;  %v702_v26 = vld [vmem:[%s835_s5 + $0x18] sm:$0xff] (!%p239_p2)   ;;  %v621_v27 = vld [vmem:[%s834_s4] ss:$0 sm:$0xff] (!%p239_p2) }
   0xa   : > { %660 = vmatprep.subr.bf16.mxu1 (!%p239_p2), %v719_v1  ;;  %v627_v37 = vld [vmem:[%s836_s6] ss:$0 sm:$0xff] (!%p239_p2)  ;;  %vm547_vm4 = vcmp.ge.s32.totalorder (!%p239_p2), %v530_v51, 64 }
   0xb   : > { %653 = vmatpush3.bf16.msra.mxu0 (!%p239_p2), %v313_v6 }
   0xc   : > { %670 = vmatprep.subr.bf16.mxu0 (!%p239_p2), %v719_v1 }
   0xd   : > { %s839_s30 = smov (!%p271_p3, %s613_s30), 7  ;;  %661 = vmatpush3.bf16.msra.mxu1 %v696_v7 }
   0xe   : > { %s614_s12 = sshll.u32 %s839_s30, 3  ;;  %662 = vmatprep.subr.bf16.mxu1 %v719_v1 }
   0xf   : > { %s274_s15 = scalar_lea.vmem %s830_s0, %s614_s12  ;;  %s280_s16 = scalar_lea.vmem %s837_s7, %s614_s12 }
  0x10   : > { %v283_v8 = vld [vmem:[%s274_s15] sm:$0xff]  ;;  %v284_v9 = vld [vmem:[%s274_s15 + $0x8] sm:$0xff] }
  0x11   : > { %v285_v10 = vpack.c.bf16 %v284_v9, %v283_v8  ;;  %663 = vmatpush3.bf16.msra.mxu1 %v697_v11 }
  0x12   : > { %664 = vmatprep.subr.bf16.mxu1 %v719_v1 }
  0x13   : > { %655 = vmatmul.mubr.msk.bf16.vlgmr.msra.gmra.mrb[0].mxu0 %vm305_vm2, %v285_v10 }
  0x14   : > { %678 = vmatprep.mubr.msk.bf16.mxu0 %vm721_vm1, %v719_v1  ;;  %671 = vmatpush3.bf16.msra.mxu0 %v699_v13 }
  0x15   : > { %665 = vmatpush3.bf16.msra.mxu1 %v698_v12  ;;  %672 = vmatprep.subr.bf16.mxu0 %v719_v1 }
  0x18   : > { %673 = vmatpush3.bf16.msra.mxu0 %v700_v14 }
  0x19   : > { %674 = vmatprep.subr.bf16.mxu0 %v719_v1 }
  0x1c   : > { %675 = vmatpush3.bf16.msra.mxu0 %v701_v25 }
  0x1d   : > { %676 = vmatprep.subr.bf16.mxu0 %v719_v1 }
  0x20   : > { %677 = vmatpush3.bf16.msra.mxu0 %v702_v26 }
  0xe6   : > { %v349_v16 = vpop.f32.mrb[0].mxu0 }
  0xe7   : > { %v350_v17 = vadd.f32 %v617_v15, %v349_v16  ;;  %v656_v18 = vpop.f32.mrb[1].mxu0 }
  0xe8   : > { %v352_v19 = vpop.f32.mrb[2].mxu0 }
  0xe9   : > { %v353_v20 = vadd.f32 %v617_v15, %v352_v19  ;;  %v657_v21 = vpop.f32.mrb[3].mxu0  ;;  %v356_v22 = vmax.f32 %v350_v17, 0.0 }
  0xeb   : > { %v357_v23 = vmax.f32 %v353_v20, 0.0 }
  0xed   : > { %v358_v24 = vpack.c.bf16 %v357_v23, %v356_v22 }
  0xef   : > { %667 = vmatmul.mubr.msk.bf16.vlgmr.msra.gmra.mrb[0].mxu1 %vm398_vm3, %v358_v24 }
 0x1c2   : > { %v436_v28 = vpop.f32.mrb[0].mxu1 }
 0x1c3   : > { %v437_v29 = vadd.f32 %v621_v27, %v436_v28  ;;  %v668_v30 = vpop.f32.mrb[1].mxu1 }
 0x1c4   : > { %v439_v31 = vpop.f32.mrb[2].mxu1 }
 0x1c5   : > { %v440_v32 = vadd.f32 %v621_v27, %v439_v31  ;;  %v669_v33 = vpop.f32.mrb[3].mxu1  ;;  %v443_v34 = vmax.f32 %v437_v29, 0.0 }
 0x1c7   : > { %v444_v35 = vmax.f32 %v440_v32, 0.0 }
 0x1c9   : > { %v445_v36 = vpack.c.bf16 %v444_v35, %v443_v34 }
 0x1cb   : > { %679 = vmatmul.mubr.msk.bf16.vlgmr.msra.gmra.mrb[4].mxu0 %vm398_vm3, %v445_v36 }
 0x29e   : > { %v522_v38 = vpop.f32.mrb[4].mxu0 }
 0x29f   : > { %v523_v39 = vadd.f32 %v627_v37, %v522_v38  ;;  %v680_v40 = vpop.f32.mrb[5].mxu0 }
 0x2a0   : > { %v525_v41 = vpop.f32.mrb[6].mxu0 }
 0x2a1   : > { %v633_v42 = vmul.f32 -1.442695, %v523_v39  ;;  %v526_v43 = vadd.f32 %v627_v37, %v525_v41  ;;  %v681_v44 = vpop.f32.mrb[7].mxu0 }
 0x2a3   : > { %703 = vpow2.f32 %v633_v42  ;;  %v634_v45 = vmul.f32 -1.442695, %v526_v43 }
 0x2a5   : > { %705 = vpow2.f32 %v634_v45 }
 0x2ad   : > { %v704_v46 = vpop.eup %703 }
 0x2ae   : > { %v537_v47 = vadd.f32 1.0, %v704_v46 }
 0x2af   : > { %v706_v48 = vpop.eup %705 }
 0x2b0   : > { %707 = vrcp.f32 %v537_v47  ;;  %v538_v49 = vadd.f32 1.0, %v706_v48 }
 0x2b2   : > { %709 = vrcp.f32 %v538_v49 }
 0x2ba   : > { %v708_v52 = vpop.eup %707 }
 0x2bb   : > { %v543_v53 = vmul.f32 7.0, %v708_v52 }
 0x2bc   : > { %v710_v54 = vpop.eup %709 }
 0x2bd   : > { %v545_v55 = vadd.f32 1e-08, %v543_v53  ;;  %v544_v56 = vmul.f32 7.0, %v710_v54 }
 0x2bf   : > { %v548_v57 = vsel %vm547_vm4, %v545_v55, %v523_v39  ;;  %v546_v58 = vadd.f32 1e-08, %v544_v56 }
 0x2c0   : > { %550 = vst [vmem:[%s280_s16] sm:$0xff] %v548_v57 }
 0x2c1   : > { %v549_v59 = vsel %vm547_vm4, %v546_v58, %v526_v43 }
 0x2c2   : > { %551 = vst [vmem:[%s280_s16 + $0x8] sm:$0xff] %v549_v59 }
 0x2c3 PF: > { %s17_s24 = sadd.s32 1, %s717_s24  }
 0x2c4   : > { %p14_p4 = scmp.ge.s32.totalorder %s17_s24, 6  }
 0x2c6   :  { %16 = sbr.rel (!%p14_p4) target bundleno = 1 (0x1), region = 78 }

</bundles_post_ra>
